<compile_context>
chip_gen: v6e
topology: v6e:2x2x1
jax: 0.10.0
libtpu: 0.0.40
codegen_flags: <defaults>
</compile_context>

<pallas_src>
import math

import jax
import jax.numpy as jnp
from jax.experimental import pallas as pl
from jax.experimental.pallas import tpu as pltpu

LANE = 128


def _round_up(n: int, m: int) -> int:
    return ((n + m - 1) // m) * m


def _make_dqn_kernel(num_actions: int):
    def kernel(x_ref, w1_ref, b1_ref, w2_ref, b2_ref, q_ref, act_ref):
        # Layer 1: (TB, IN) @ (IN, H_pad) -> f32 accumulation on the MXU.
        h = jnp.dot(x_ref[...], w1_ref[...], preferred_element_type=jnp.float32)
        h = h + b1_ref[...]            # bias add in f32 (VPU)
        h = jnp.tanh(h)                # EUP slot — keep as tanh, do not polynomialize

        # Layer 2: (TB, H_pad) @ (H_pad, A_pad) -> f32 accumulation.
        q = jnp.dot(h.astype(w2_ref.dtype), w2_ref[...],
                    preferred_element_type=jnp.float32)
        q = q + b2_ref[...]
        q_ref[...] = q.astype(q_ref.dtype)          # lane-dense (TB, 128) store

        # Fused act(): argmax over the first `num_actions` lanes.
        lane = jax.lax.broadcasted_iota(jnp.int32, q.shape, 1)
        q_m = jnp.where(lane < num_actions, q, -jnp.inf)
        row_max = jnp.max(q_m, axis=-1, keepdims=True)
        idx = jnp.where(q_m == row_max, lane, jnp.int32(q.shape[-1]))
        act_ref[...] = jnp.min(idx, axis=-1, keepdims=True).astype(jnp.int32)

    return kernel


def dqn_forward(x, w1, b1, w2, b2, *, block_b: int = 256,
                compute_dtype=jnp.float32):
    """Batched DQN forward.

    x:  (B, IN) f32
    w1: (IN, H) f32 (PyTorch weight transposed), b1: (1, H) or (H,)
    w2: (H, A)  f32 (PyTorch weight transposed), b2: (1, A) or (A,)

    Returns (q_values (B, A) f32, actions (B,) int32).

    block_b: batch tile. 128 matches v5e's MXU, 256 matches v6e, >=512 (multiple
    of 256) feeds both v7x TensorCores. compute_dtype=jnp.bfloat16 uses the
    bf16-native MXU on v6e/v7x (f32 accumulation is always kept).
    """
    B, IN = x.shape
    H = w1.shape[1]
    A = w2.shape[1]
    H_pad = _round_up(H, LANE)
    A_pad = _round_up(A, LANE)

    # Batch tiling: round tiny batches up to a sublane multiple, cap at block_b.
    TB = min(block_b, _round_up(B, 8))
    B_pad = _round_up(B, TB)

    xd = x.astype(compute_dtype)
    if B_pad != B:
        xd = jnp.pad(xd, ((0, B_pad - B), (0, 0)))

    # Zero-pad weights/biases to lane-multiple widths (padded hidden lanes give
    # tanh(0)=0, padded action lanes give q=0; both are sliced off / masked out).
    w1p = jnp.pad(w1, ((0, 0), (0, H_pad - H))).astype(compute_dtype)
    b1p = jnp.pad(b1.reshape(1, H).astype(jnp.float32), ((0, 0), (0, H_pad - H)))
    w2p = jnp.pad(w2, ((0, H_pad - H), (0, A_pad - A))).astype(compute_dtype)
    b2p = jnp.pad(b2.reshape(1, A).astype(jnp.float32), ((0, 0), (0, A_pad - A)))

    grid = (B_pad // TB,)

    q_pad, act_pad = pl.pallas_call(
        _make_dqn_kernel(A),
        out_shape=(
            jax.ShapeDtypeStruct((B_pad, A_pad), jnp.float32),
            jax.ShapeDtypeStruct((B_pad, 1), jnp.int32),
        ),
        grid_spec=pltpu.PrefetchScalarGridSpec(
            num_scalar_prefetch=0,
            grid=grid,
            in_specs=[
                pl.BlockSpec((TB, IN), lambda i: (i, 0)),      # activations stream
                pl.BlockSpec((IN, H_pad), lambda i: (0, 0)),   # weights VMEM-resident
                pl.BlockSpec((1, H_pad), lambda i: (0, 0)),
                pl.BlockSpec((H_pad, A_pad), lambda i: (0, 0)),
                pl.BlockSpec((1, A_pad), lambda i: (0, 0)),
            ],
            out_specs=(
                pl.BlockSpec((TB, A_pad), lambda i: (i, 0)),   # lane-dense q slab
                pl.BlockSpec((TB, 1), lambda i: (i, 0)),       # fused argmax
            ),
        ),
        compiler_params=pltpu.CompilerParams(
            dimension_semantics=("parallel",),                 # shard batch across TCs
        ),
    )(xd, w1p, b1p, w2p, b2p)

    return q_pad[:B, :A], act_pad[:B, 0]


def init_params(key, in_features, hidden, actions):
    # Deterministic init mimicking PyTorch nn.Linear default:
    # U(-1/sqrt(fan_in), 1/sqrt(fan_in)) for both weight and bias.
    k1, k2, k3, k4 = jax.random.split(key, 4)
    bound1 = 1.0 / math.sqrt(in_features)
    bound2 = 1.0 / math.sqrt(hidden)
    # Stored as (in, out) (PyTorch weight transposed) for x @ W.
    w1 = jax.random.uniform(k1, (in_features, hidden), jnp.float32, -bound1, bound1)
    b1 = jax.random.uniform(k2, (1, hidden), jnp.float32, -bound1, bound1)
    w2 = jax.random.uniform(k3, (hidden, actions), jnp.float32, -bound2, bound2)
    b2 = jax.random.uniform(k4, (1, actions), jnp.float32, -bound2, bound2)
    return w1, b1, w2, b2


if __name__ == "__main__":
    # LunarLander-v2: observation_space.shape = (8,), action_space.n = 4
    # TODO(synk): gym env / replay-buffer / training glue is host-side and not a kernel.
    IN_FEATURES = 8
    HIDDEN = 64
    ACTIONS = 4
    BATCH = 2

    key = jax.random.PRNGKey(0)
    kx, kp = jax.random.split(key)
    x = jax.random.normal(kx, (BATCH, IN_FEATURES), jnp.float32)
    w1, b1, w2, b2 = init_params(kp, IN_FEATURES, HIDDEN, ACTIONS)

    # act()-style path: tiny batch, f32, fused argmax.
    q_values, actions = dqn_forward(x, w1, b1, w2, b2)
    jax.block_until_ready((q_values, actions))

    ref = jnp.tanh(x @ w1 + b1) @ w2 + b2
    assert q_values.shape == (BATCH, ACTIONS)
    assert jnp.allclose(q_values, ref, atol=1e-4, rtol=1e-4)
    # Fused argmax is computed from the kernel's own q tile -> exact self-consistency.
    assert jnp.array_equal(actions, jnp.argmax(q_values, axis=1).astype(jnp.int32))
    _action = int(actions[0])  # `act()` equivalent

    # Replay-batch path: larger batch, bf16 MXU operands (v6e/v7x fast path), f32 accum.
    xb = jax.random.normal(kx, (512, IN_FEATURES), jnp.float32)
    qb, actb = dqn_forward(xb, w1, b1, w2, b2, block_b=256,
                           compute_dtype=jnp.bfloat16)
    jax.block_until_ready((qb, actb))
    refb = jnp.tanh(xb @ w1 + b1) @ w2 + b2
    assert float(jnp.max(jnp.abs(qb - refb))) < 5e-2
    assert jnp.array_equal(actb, jnp.argmax(qb, axis=1).astype(jnp.int32))

    print("KERNEL_OK")
</pallas_src>

<mosaic_0001>
module attributes {stable_mosaic.version = 11 : i64} {
  func.func @kernel(%arg0: i32, %arg1: memref<8x8xf32, #tpu.memory_space<vmem>>, %arg2: memref<8x128xf32, #tpu.memory_space<vmem>>, %arg3: memref<1x128xf32, #tpu.memory_space<vmem>>, %arg4: memref<128x128xf32, #tpu.memory_space<vmem>>, %arg5: memref<1x128xf32, #tpu.memory_space<vmem>>, %arg6: memref<8x128xf32, #tpu.memory_space<vmem>>, %arg7: memref<8x1xi32, #tpu.memory_space<vmem>>) attributes {dimension_semantics = [#tpu.dimension_semantics<parallel>], iteration_bounds = array<i64: 1>, scalar_prefetch = 0 : i64, scratch_operands = 0 : i64, tpu.core_type = #tpu.core_type<tc>, window_params = [{transform_indices = @transform_0, window_bounds = array<i64: 8, 8>}, {pipeline_mode = #tpu.pipeline_mode<synchronous>, transform_indices = @transform_1, window_bounds = array<i64: 8, 128>}, {pipeline_mode = #tpu.pipeline_mode<synchronous>, transform_indices = @transform_2, window_bounds = array<i64: 1, 128>}, {pipeline_mode = #tpu.pipeline_mode<synchronous>, transform_indices = @transform_3, window_bounds = array<i64: 128, 128>}, {pipeline_mode = #tpu.pipeline_mode<synchronous>, transform_indices = @transform_4, window_bounds = array<i64: 1, 128>}, {transform_indices = @transform_5, window_bounds = array<i64: 8, 128>}, {transform_indices = @transform_6, window_bounds = array<i64: 8, 1>}]} {
    %c0 = arith.constant 0 : index
    %c0_0 = arith.constant 0 : index
    %0 = vector.load %arg1[%c0, %c0_0] : memref<8x8xf32, #tpu.memory_space<vmem>>, vector<8x8xf32>
    %c0_1 = arith.constant 0 : index
    %c0_2 = arith.constant 0 : index
    %1 = vector.load %arg2[%c0_1, %c0_2] : memref<8x128xf32, #tpu.memory_space<vmem>>, vector<8x128xf32>
    %cst = arith.constant dense<0.000000e+00> : vector<8x128xf32>
    %2 = tpu.matmul %0, %1, %cst {dimension_numbers = #tpu.dot_dimension_numbers<[1], [0], [0], [1], [0, 0, 1, 1], [], []>} : vector<8x8xf32>, vector<8x128xf32>, vector<8x128xf32> -> vector<8x128xf32>
    %c0_3 = arith.constant 0 : index
    %c0_4 = arith.constant 0 : index
    %3 = vector.load %arg3[%c0_3, %c0_4] : memref<1x128xf32, #tpu.memory_space<vmem>>, vector<1x128xf32>
    %4 = vector.broadcast %3 : vector<1x128xf32> to vector<8x128xf32>
    %5 = arith.addf %2, %4 : vector<8x128xf32>
    %6 = math.tanh %5 : vector<8x128xf32>
    %c0_5 = arith.constant 0 : index
    %c0_6 = arith.constant 0 : index
    %7 = vector.load %arg4[%c0_5, %c0_6] : memref<128x128xf32, #tpu.memory_space<vmem>>, vector<128x128xf32>
    %cst_7 = arith.constant dense<0.000000e+00> : vector<8x128xf32>
    %8 = tpu.matmul %6, %7, %cst_7 {dimension_numbers = #tpu.dot_dimension_numbers<[1], [0], [0], [1], [0, 0, 1, 1], [], []>} : vector<8x128xf32>, vector<128x128xf32>, vector<8x128xf32> -> vector<8x128xf32>
    %c0_8 = arith.constant 0 : index
    %c0_9 = arith.constant 0 : index
    %9 = vector.load %arg5[%c0_8, %c0_9] : memref<1x128xf32, #tpu.memory_space<vmem>>, vector<1x128xf32>
    %10 = vector.broadcast %9 : vector<1x128xf32> to vector<8x128xf32>
    %11 = arith.addf %8, %10 : vector<8x128xf32>
    %c0_10 = arith.constant 0 : index
    %c0_11 = arith.constant 0 : index
    %12 = vector.load %arg6[%c0_10, %c0_11] : memref<8x128xf32, #tpu.memory_space<vmem>>, vector<8x128xf32>
    tpu.vector_store %arg6[%c0_10, %c0_11], %11 {strides = array<i32>} : memref<8x128xf32, #tpu.memory_space<vmem>>, vector<8x128xf32>,
    %13 = tpu.iota {dimensions = array<i32: 1>} : vector<8x128xi32>
    %c4_i32 = arith.constant 4 : i32
    %14 = vector.broadcast %c4_i32 : i32 to vector<8x128xi32>
    %15 = arith.cmpi slt, %13, %14 : vector<8x128xi32>
    %cst_12 = arith.constant 0xFF800000 : f32
    %16 = vector.broadcast %cst_12 : f32 to vector<8x128xf32>
    %17 = arith.select %15, %11, %16 : vector<8x128xi1>, vector<8x128xf32>
    %cst_13 = arith.constant dense<0xFF800000> : vector<8xf32>
    %18 = vector.multi_reduction <maximumf>, %17, %cst_13 [1] : vector<8x128xf32> to vector<8xf32>
    %19 = vector.shape_cast %18 : vector<8xf32> to vector<8x1xf32>
    %20 = vector.broadcast %19 : vector<8x1xf32> to vector<8x128xf32>
    %21 = arith.cmpf oeq, %17, %20 : vector<8x128xf32>
    %c128_i32 = arith.constant 128 : i32
    %22 = vector.broadcast %c128_i32 : i32 to vector<8x128xi32>
    %23 = arith.select %21, %13, %22 : vector<8x128xi1>, vector<8x128xi32>
    %cst_14 = arith.constant dense<2147483647> : vector<8xi32>
    %24 = vector.multi_reduction <minsi>, %23, %cst_14 [1] : vector<8x128xi32> to vector<8xi32>
    %25 = vector.shape_cast %24 : vector<8xi32> to vector<8x1xi32>
    %c0_15 = arith.constant 0 : index
    %c0_16 = arith.constant 0 : index
    %26 = vector.load %arg7[%c0_15, %c0_16] : memref<8x1xi32, #tpu.memory_space<vmem>>, vector<8x1xi32>
    tpu.vector_store %arg7[%c0_15, %c0_16], %25 {strides = array<i32>} : memref<8x1xi32, #tpu.memory_space<vmem>>, vector<8x1xi32>,
    return
  }
  func.func @transform_0(%arg0: i32) -> (i32, i32) {
    %c0_i32 = arith.constant 0 : i32
    %c0_i32_0 = arith.constant 0 : i32
    return %arg0, %c0_i32 : i32, i32
  }
  func.func @transform_1(%arg0: i32) -> (i32, i32) {
    %c0_i32 = arith.constant 0 : i32
    %c0_i32_0 = arith.constant 0 : i32
    %c0_i32_1 = arith.constant 0 : i32
    return %c0_i32, %c0_i32_0 : i32, i32
  }
  func.func @transform_2(%arg0: i32) -> (i32, i32) {
    %c0_i32 = arith.constant 0 : i32
    %c0_i32_0 = arith.constant 0 : i32
    %c0_i32_1 = arith.constant 0 : i32
    return %c0_i32, %c0_i32_0 : i32, i32
  }
  func.func @transform_3(%arg0: i32) -> (i32, i32) {
    %c0_i32 = arith.constant 0 : i32
    %c0_i32_0 = arith.constant 0 : i32
    %c0_i32_1 = arith.constant 0 : i32
    return %c0_i32, %c0_i32_0 : i32, i32
  }
  func.func @transform_4(%arg0: i32) -> (i32, i32) {
    %c0_i32 = arith.constant 0 : i32
    %c0_i32_0 = arith.constant 0 : i32
    %c0_i32_1 = arith.constant 0 : i32
    return %c0_i32, %c0_i32_0 : i32, i32
  }
  func.func @transform_5(%arg0: i32) -> (i32, i32) {
    %c0_i32 = arith.constant 0 : i32
    %c0_i32_0 = arith.constant 0 : i32
    return %arg0, %c0_i32 : i32, i32
  }
  func.func @transform_6(%arg0: i32) -> (i32, i32) {
    %c0_i32 = arith.constant 0 : i32
    %c0_i32_0 = arith.constant 0 : i32
    return %arg0, %c0_i32 : i32, i32
  }
}

</mosaic_0001>

<bundles_post_ra>
// kernel: tpu_custom_call.1
= control target key start
LH: loop header
LB: loop body
LE: loop exit
PB: predicated region body
PF: predicated region fallthrough
CT: control target
= control target key end

     0   :  { %12 = vsyncpa [#allocation3], 0  ;;  %s504_s0 = inlined_call_operand.hbm [shape: f32[8,8], index: 0, kind: input, shape index: {}]   ;;  %s505_s1 = inlined_call_operand.hbm [shape: f32[8,128], index: 1, kind: input, shape index: {}]   ;;  %s506_s2 = inlined_call_operand.vmem [shape: f32[1,128], index: 2, kind: input, shape index: {}]   ;;  %s507_s3 = inlined_call_operand.hbm [shape: f32[128,128], index: 3, kind: input, shape index: {}]   ;;  %s508_s4 = inlined_call_operand.vmem [shape: f32[1,128], index: 4, kind: input, shape index: {}]   ;;  %s509_s5 = inlined_call_operand.hbm [shape: f32[8,128], index: 5, kind: output, shape index: {0}]   ;;  %s510_s6 = inlined_call_operand.vmem [shape: s32[8,1], index: 6, kind: output, shape index: {1}]  }
   0x1   :  { %13 = vsyncpa [#allocation6], 0 }
   0x2   :  { %14 = vsyncpa [#allocation4], 0  ;;  %s440_s21 = smov [#allocation5]   ;;  %s441_s23 = smov [#allocation2]  }
   0x3   :  { %s31_s22 = sshll.u32 %s440_s21, 4  ;;  %s21_s24 = sshll.u32 %s441_s23, 4  ;;  %s32_s22 = int_to_ptr.vmem [resolvable:$true] %s31_s22  ;;  %s22_s24 = int_to_ptr.vmem [resolvable:$true] %s21_s24 }
   0x4   :  { %s362_s25 = scalar_lea.vmem %s32_s22, 128  ;;  %p367_p1 = scmp.lt.s32.totalorder %s32_s22, %s32_s22 }
   0x5   :  { %p363_p0 = scmp.ne.s32.totalorder %s32_s22, %s362_s25  ;;  %p368_p2 = scmp.lt.s32.totalorder %s362_s25, %s362_s25 }
   0x7   :  { %p369_p3 = por %p368_p2, %p367_p1 }
   0x9   :  { %p370_p4 = pnand %p369_p3, %p363_p0 }
   0xb   :  { %373 = shalt.err (!%p370_p4)
}
   0xc   :  { %34 = dma.hbm_to_vmem [thread:$0]  %s505_s1, 128, %s32_s22, [#allocation6]  }
   0xd   :  { %s382_s28 = scalar_lea.vmem %s22_s24, 128  ;;  %p387_p6 = scmp.lt.s32.totalorder %s22_s24, %s22_s24 }
   0xe   :  { %p383_p5 = scmp.ne.s32.totalorder %s22_s24, %s382_s28  ;;  %p388_p7 = scmp.lt.s32.totalorder %s382_s28, %s382_s28 }
  0x10   :  { %p389_p8 = por %p388_p7, %p387_p6 }
  0x12   :  { %p390_p9 = pnand %p389_p8, %p383_p5 }
  0x14   :  { %393 = shalt.err (!%p390_p9)
}
  0x15   :  { %24 = dma.hbm_to_vmem [thread:$0]  %s504_s0, 128, %s22_s24, [#allocation3]  }
  0x16   :  { %s442_s7 = smov [#allocation7]  }
  0x17   :  { %s42_s8 = sshll.u32 %s442_s7, 4  ;;  %s43_s8 = int_to_ptr.vmem [resolvable:$true] %s42_s8 }
  0x18   :  { %s402_s9 = scalar_lea.vmem %s43_s8, 2048  ;;  %p407_p11 = scmp.lt.s32.totalorder %s43_s8, %s43_s8 }
  0x19   :  { %p403_p10 = scmp.ne.s32.totalorder %s43_s8, %s402_s9  ;;  %p408_p12 = scmp.lt.s32.totalorder %s402_s9, %s402_s9 }
  0x1b   :  { %p409_p13 = por %p408_p12, %p407_p11 }
  0x1d   :  { %p410_p0 = pnand %p409_p13, %p403_p10 }
  0x1f   :  { %413 = shalt.err (!%p410_p0)
}
  0x20   :  { %s443_s1 = smov 128   ;;  %s444_s10 = smov 8  }
  0x21   :  { %48 = dma.hbm_to_vmem [thread:$0]  %s507_s3, 2048, %s43_s8, [#allocation6], %s443_s1, %s443_s1, %s444_s10  }
  0x22   :  { %434 = dma.done.wait [#allocation3], 128  }
  0x23   :  { %435 = vsyncadd [#allocation3], 4294967168 }
  0x24   :  { %436 = dma.done.wait [#allocation6], 2176  }
  0x25   :  { %437 = vsyncadd [#allocation6], 4294965120  ;;  %v445_v0 = vmov 0.0   ;;  %vm446_vm0 = vmmov 0   ;;  %vm69_vm1 = vcmask 64512   ;;  %v61_v1 = vld [vmem:[#allocation5] sm:$0xff]  ;;  %v238_v24 = vlaneseq }
  0x26   :  { %304 = vmatprep.subr.mxu0 %v445_v0  ;;  %306 = vmatprep.mubr.msk.f32.mxu0 %vm446_vm0, %v445_v0  ;;  %v60_v2 = vld [vmem:[#allocation2] sm:$0xff]  ;;  %v159_v3 = vld [vmem:[#allocation7 + $0x78] sm:$0xff]  ;;  %v157_v5 = vld [vmem:[#allocation7 + $0x68] sm:$0xff] }
  0x27   :  { %309 = vmatprep.subr.mxu1 %v445_v0  ;;  %341 = vmatprep.mubr.msk.f32.mxu1 %vm446_vm0, %v445_v0  ;;  %v158_v4 = vld [vmem:[#allocation7 + $0x70] sm:$0xff]  ;;  %v156_v6 = vld [vmem:[#allocation7 + $0x60] sm:$0xff]  ;;  %v155_v7 = vld [vmem:[#allocation7 + $0x58] sm:$0xff]  ;;  %v239_v25 = vand.u32 127, %v238_v24 }
  0x28   :  { %305 = vmatpush3.msra.mxu0 %v61_v1  ;;  %310 = vmatpush3.msra.mxu1 %v159_v3  ;;  %v154_v8 = vld [vmem:[#allocation7 + $0x50] sm:$0xff]  ;;  %v153_v9 = vld [vmem:[#allocation7 + $0x48] sm:$0xff]  ;;  %v152_v10 = vld [vmem:[#allocation7 + $0x40] sm:$0xff] }
  0x29   :  { %307 = vmatmul.mubr.msk.f32.vlgmr.msra.gmra.mxu0 %vm69_vm1, %v60_v2  ;;  %311 = vmatprep.subr.mxu1 %v445_v0  ;;  %v151_v11 = vld [vmem:[#allocation7 + $0x38] sm:$0xff]  ;;  %v150_v12 = vld [vmem:[#allocation7 + $0x30] sm:$0xff]  ;;  %v149_v13 = vld [vmem:[#allocation7 + $0x28] sm:$0xff]  ;;  %vm240_vm2 = vcmp.lt.s32.totalorder %v239_v25, 4 }
  0x2a   :  { %312 = vmatpush3.msra.mxu1 %v158_v4  ;;  %v148_v14 = vld [vmem:[#allocation7 + $0x20] sm:$0xff]  ;;  %v147_v15 = vld [vmem:[#allocation7 + $0x18] sm:$0xff]  ;;  %v146_v16 = vld [vmem:[#allocation7 + $0x10] sm:$0xff] }
  0x2b   :  { %313 = vmatprep.subr.mxu1 %v445_v0  ;;  %v145_v17 = vld [vmem:[#allocation7 + $0x8] sm:$0xff]  ;;  %v144_v18 = vld [vmem:[#allocation7] sm:$0xff]  ;;  %v282_v19 = vld [vmem:[%s506_s2] ss:$0 sm:$0xff]  ;;  %s447_s2 = smov [#allocation8]  }
  0x2c   :  { %314 = vmatpush3.msra.mxu1 %v157_v5  ;;  %v284_v26 = vld [vmem:[%s508_s4] ss:$0 sm:$0xff]  ;;  %s268_s4 = sshll.u32 %s447_s2, 4  ;;  %s269_s4 = int_to_ptr.vmem [resolvable:$true] %s268_s4 }
  0x2d   :  { %315 = vmatprep.subr.mxu1 %v445_v0  ;;  %s414_s15 = scalar_lea.vmem %s269_s4, 128  ;;  %p419_p2 = scmp.lt.s32.totalorder %s269_s4, %s269_s4 }
  0x2e   :  { %316 = vmatpush3.msra.mxu1 %v156_v6  ;;  %p415_p1 = scmp.ne.s32.totalorder %s269_s4, %s414_s15  ;;  %p420_p3 = scmp.lt.s32.totalorder %s414_s15, %s414_s15 }
  0x2f   :  { %317 = vmatprep.subr.mxu1 %v445_v0 }
  0x30   :  { %318 = vmatpush3.msra.mxu1 %v155_v7  ;;  %p421_p4 = por %p420_p3, %p419_p2 }
  0x31   :  { %319 = vmatprep.subr.mxu1 %v445_v0 }
  0x32   :  { %320 = vmatpush3.msra.mxu1 %v154_v8  ;;  %p422_p5 = pnand %p421_p4, %p415_p1 }
  0x33   :  { %321 = vmatprep.subr.mxu1 %v445_v0 }
  0x34   :  { %322 = vmatpush3.msra.mxu1 %v153_v9 }
  0x35   :  { %323 = vmatprep.subr.mxu1 %v445_v0 }
  0x36   :  { %324 = vmatpush3.msra.mxu1 %v152_v10 }
  0x37   :  { %325 = vmatprep.subr.mxu1 %v445_v0 }
  0x38   :  { %326 = vmatpush3.msra.mxu1 %v151_v11 }
  0x39   :  { %327 = vmatprep.subr.mxu1 %v445_v0 }
  0x3a   :  { %328 = vmatpush3.msra.mxu1 %v150_v12 }
  0x3b   :  { %329 = vmatprep.subr.mxu1 %v445_v0 }
  0x3c   :  { %330 = vmatpush3.msra.mxu1 %v149_v13 }
  0x3d   :  { %331 = vmatprep.subr.mxu1 %v445_v0 }
  0x3e   :  { %332 = vmatpush3.msra.mxu1 %v148_v14 }
  0x3f   :  { %333 = vmatprep.subr.mxu1 %v445_v0 }
  0x40   :  { %334 = vmatpush3.msra.mxu1 %v147_v15 }
  0x41   :  { %335 = vmatprep.subr.mxu1 %v445_v0 }
  0x42   :  { %336 = vmatpush3.msra.mxu1 %v146_v16 }
  0x43   :  { %337 = vmatprep.subr.mxu1 %v445_v0 }
  0x44   :  { %338 = vmatpush3.msra.mxu1 %v145_v17 }
  0x45   :  { %339 = vmatprep.subr.mxu1 %v445_v0 }
  0x46   :  { %340 = vmatpush3.msra.mxu1 %v144_v18 }
  0xe9   :  { %v139_v20 = vpop.f32.mrf.mxu0 }
  0xea   :  { %v140_v21 = vadd.f32 %v282_v19, %v139_v20 }
  0xeb   :  { %v308_v22 = vpop.f32.mrf.mxu0 }
  0xec   :  { %352 = vtanh.f32 %v140_v21 }
  0xf9   :  { %v353_v23 = vpop.eup %352 }
  0xfa   :  { %342 = vmatmul.mubr.f32.vlgmr.msra.gmra.mxu1 %v353_v23 }
 0x1ba   :  { %v233_v27 = vpop.f32.mrf.mxu1 }
 0x1bb   :  { %v234_v28 = vadd.f32 %v284_v26, %v233_v27 }
 0x1bc   :  { %v343_v29 = vpop.f32.mrf.mxu1 }
 0x1bd   :  { %237 = vst [vmem:[#allocation8] sm:$0xff] %v234_v28  ;;  %v241_v30 = vsel %vm240_vm2, %v234_v28, -inf }
 0x1be   :  { %242 = vmax.xlane.f32.xlu0 %v241_v30 }
 0x247   :  { %v243_v31 = vpop.xlane.xlu0 %242 }
 0x248   :  { %vm244_vm3 = vcmp.eq.f32.partialorder %v241_v30, %v243_v31 }
 0x249   :  { %v245_v32 = vsel %vm244_vm3, %v239_v25, 128 }
 0x24a   :  { %v247_v33 = vshra.s32 %v245_v32, 16  ;;  %v246_v35 = vand.u32 65535, %v245_v32 }
 0x24c   :  { %v249_v34 = vcvt.s32.f32 %v247_v33  ;;  %v248_v37 = vcvt.s32.f32 %v246_v35 }
 0x24e   :  { %250 = vmin.xlane.f32.xlu0 %v249_v34 }
 0x2d7   :  { %v251_v36 = vpop.xlane.xlu0 %250 }
 0x2d8   :  { %vm252_vm4 = vcmp.eq.f32.partialorder %v249_v34, %v251_v36 }
 0x2d9   :  { %v253_v38 = vsel %vm252_vm4, %v248_v37, inf }
 0x2da   :  { %254 = vmin.xlane.f32.xlu1 %v253_v38 }
 0x2db   :  { %425 = shalt.err (!%p422_p5)
}
 0x2dc   :  { %271 = dma.vmem_to_hbm [thread:$0]  %s269_s4, 128, %s509_s5, [#allocation4]   ;;  %v257_v39 = vcvt.f32.s32 %v251_v36  ;;  %vm260_vm5 = vcmask 7168  }
 0x2de   :  { %v258_v41 = vshll.u32 %v257_v39, 16 }
 0x363   :  { %v255_v40 = vpop.xlane.xlu1 %254 }
 0x364   :  { %v256_v42 = vcvt.f32.s32 %v255_v40 }
 0x366   :  { %v259_v43 = vadd.s32 %v258_v41, %v256_v42 }
 0x368   :  { %261 = vst.msk [vmem:[%s510_s6] sm:$0xff] %vm260_vm5, %v259_v43 }
 0x369   :  { %438 = dma.done.wait [#allocation4], 128  }
 0x36a   :  { %439 = vsyncadd [#allocation4], 4294967168 }
 0x36b   :  { %279 = vsyncpa [#allocation3], 1 }
 0x36c   :  { %280 = vsyncpa [#allocation6], 1 }
 0x36d   :  { %281 = vsyncpa [#allocation4], 1 }

</bundles_post_ra>
